<compile_context>
chip_gen: v7x
topology: tpu7x:2x2x1
jax: 0.10.0
libtpu: 0.0.40
codegen_flags: <defaults>
</compile_context>

<pallas_src>
import jax
import jax.numpy as jnp
from jax.experimental import pallas as pl
from jax.experimental.pallas import tpu as pltpu

D_PART = 64                 # feature width of each of x0..x3
N_PARTS = 4
D_FULL = D_PART * N_PARTS   # 256
N_CLS = 10                  # classes per classifier
N_OUT = 128                 # lane-dense padded fused output width (cols 0:30 used)
TM_MAX = 1024               # max batch rows per grid step


def _round_up(x, m):
    return ((x + m - 1) // m) * m


def _vfl_server_kernel(x0_ref, x1_ref, x2_ref, x3_ref, w_ref, b_ref, out_ref):
    # x_i: [TM, 64]   w: [256, 128]   b: [1, 128]   out: [TM, 128]
    # Row slices of w_ref are at multiples of 64 (tile-aligned for f32 (8,128)).
    acc = jnp.dot(x0_ref[...], w_ref[0 * D_PART:1 * D_PART, :],
                  preferred_element_type=jnp.float32)
    acc = acc + jnp.dot(x1_ref[...], w_ref[1 * D_PART:2 * D_PART, :],
                        preferred_element_type=jnp.float32)
    acc = acc + jnp.dot(x2_ref[...], w_ref[2 * D_PART:3 * D_PART, :],
                        preferred_element_type=jnp.float32)
    acc = acc + jnp.dot(x3_ref[...], w_ref[3 * D_PART:4 * D_PART, :],
                        preferred_element_type=jnp.float32)
    out_ref[...] = acc + b_ref[...]


def pack_fused_params(params):
    """Build the block-structured fused weight [256, 128] and bias [1, 128].

    Column layout: 0:10 -> classifier_A, 10:20 -> classifier_B,
    20:30 -> classifier_AB, 30:128 -> exact-zero padding (lane-dense output).
    """
    wA, bA = params["classifier_A"]      # [128, 10], [1, 10]
    wB, bB = params["classifier_B"]      # [128, 10], [1, 10]
    wAB, bAB = params["classifier_AB"]   # [256, 10], [1, 10]

    w = jnp.zeros((D_FULL, N_OUT), jnp.float32)
    w = w.at[0:2 * D_PART, 0:N_CLS].set(wA)
    w = w.at[2 * D_PART:4 * D_PART, N_CLS:2 * N_CLS].set(wB)
    w = w.at[:, 2 * N_CLS:3 * N_CLS].set(wAB)

    b = jnp.zeros((1, N_OUT), jnp.float32)
    b = b.at[:, 0:N_CLS].set(bA)
    b = b.at[:, N_CLS:2 * N_CLS].set(bB)
    b = b.at[:, 2 * N_CLS:3 * N_CLS].set(bAB)
    return w, b


def vfl_server_forward(x_parts, w_fused, b_fused, *, tm_max=TM_MAX):
    """x_parts: 4 arrays, each [B, 64].  Returns (result_A, result_B, result_AB)."""
    x0, x1, x2, x3 = x_parts
    B = x0.shape[0]

    # Batch tile: biggest multiple of 8 that covers B, capped at tm_max.
    TM = min(tm_max, _round_up(B, 8))
    B_pad = _round_up(B, TM)
    if B_pad != B:
        pad = lambda a: jnp.pad(a, ((0, B_pad - B), (0, 0)))
        x0, x1, x2, x3 = pad(x0), pad(x1), pad(x2), pad(x3)
    grid = (B_pad // TM,)

    x_spec = pl.BlockSpec((TM, D_PART), lambda i: (i, 0))
    w_spec = pl.BlockSpec((D_FULL, N_OUT), lambda i: (0, 0))   # resident
    b_spec = pl.BlockSpec((1, N_OUT), lambda i: (0, 0))        # resident
    out_spec = pl.BlockSpec((TM, N_OUT), lambda i: (i, 0))

    cost = pl.CostEstimate(
        flops=2 * B_pad * D_FULL * N_OUT,
        transcendentals=0,
        bytes_accessed=(N_PARTS * B_pad * D_PART * 4      # activation reads
                        + B_pad * N_OUT * 4               # fused output write
                        + D_FULL * N_OUT * 4 + N_OUT * 4  # weights + bias
                        ),
    )

    out = pl.pallas_call(
        _vfl_server_kernel,
        out_shape=jax.ShapeDtypeStruct((B_pad, N_OUT), jnp.float32),
        grid=grid,
        in_specs=[x_spec, x_spec, x_spec, x_spec, w_spec, b_spec],
        out_specs=out_spec,
        compiler_params=pltpu.CompilerParams(
            dimension_semantics=("parallel",)),
        cost_estimate=cost,
    )(x0, x1, x2, x3, w_fused, b_fused)

    result_A = out[:B, 0:N_CLS]
    result_B = out[:B, N_CLS:2 * N_CLS]
    result_AB = out[:B, 2 * N_CLS:3 * N_CLS]
    return result_A, result_B, result_AB


def init_params(key):
    """Deterministic init mimicking nn.Linear's uniform(-1/sqrt(fan_in), ...)."""
    ks = jax.random.split(key, 6)

    def linear(kw, kb, fan_in, fan_out):
        bound = 1.0 / jnp.sqrt(fan_in)
        w = jax.random.uniform(kw, (fan_in, fan_out), jnp.float32, -bound, bound)
        b = jax.random.uniform(kb, (1, fan_out), jnp.float32, -bound, bound)
        return w, b

    return {
        "classifier_AB": linear(ks[0], ks[1], D_FULL, N_CLS),
        "classifier_A": linear(ks[2], ks[3], 2 * D_PART, N_CLS),
        "classifier_B": linear(ks[4], ks[5], 2 * D_PART, N_CLS),
    }


def _reference(x_parts, params):
    x0, x1, x2, x3 = x_parts
    xA = jnp.concatenate([x0, x1], axis=1)
    xB = jnp.concatenate([x2, x3], axis=1)
    xAB = jnp.concatenate([x0, x1, x2, x3], axis=1)
    wA, bA = params["classifier_A"]
    wB, bB = params["classifier_B"]
    wAB, bAB = params["classifier_AB"]
    return xA @ wA + bA, xB @ wB + bB, xAB @ wAB + bAB


if __name__ == "__main__":
    key = jax.random.PRNGKey(0)
    k_params, k0, k1, k2, k3 = jax.random.split(key, 5)

    params = init_params(k_params)
    w_fused, b_fused = pack_fused_params(params)

    # --- main small-shape check (single grid step) ---
    B = 8
    x_parts = (
        jax.random.normal(k0, (B, D_PART), jnp.float32),
        jax.random.normal(k1, (B, D_PART), jnp.float32),
        jax.random.normal(k2, (B, D_PART), jnp.float32),
        jax.random.normal(k3, (B, D_PART), jnp.float32),
    )
    res_A, res_B, res_AB = jax.block_until_ready(
        vfl_server_forward(x_parts, w_fused, b_fused))
    ref_A, ref_B, ref_AB = _reference(x_parts, params)

    assert res_A.shape == (B, N_CLS)
    assert res_B.shape == (B, N_CLS)
    assert res_AB.shape == (B, N_CLS)
    assert jnp.allclose(res_A, ref_A, atol=1e-5)
    assert jnp.allclose(res_B, ref_B, atol=1e-5)
    assert jnp.allclose(res_AB, ref_AB, atol=1e-5)

    # --- multi-tile grid + padding check (B=20 with 8-row tiles -> grid=(3,)) ---
    B2 = 20
    k4, k5, k6, k7 = jax.random.split(jax.random.PRNGKey(1), 4)
    x_parts2 = (
        jax.random.normal(k4, (B2, D_PART), jnp.float32),
        jax.random.normal(k5, (B2, D_PART), jnp.float32),
        jax.random.normal(k6, (B2, D_PART), jnp.float32),
        jax.random.normal(k7, (B2, D_PART), jnp.float32),
    )
    res2 = jax.block_until_ready(
        vfl_server_forward(x_parts2, w_fused, b_fused, tm_max=8))
    ref2 = _reference(x_parts2, params)
    for r, rf in zip(res2, ref2):
        assert r.shape == (B2, N_CLS)
        assert jnp.allclose(r, rf, atol=1e-5)

    print("KERNEL_OK")
</pallas_src>

<mosaic_0001>
module attributes {stable_mosaic.version = 11 : i64} {
  func.func @_vfl_server_kernel(%arg0: i32, %arg1: memref<8x64xf32, #tpu.memory_space<vmem>>, %arg2: memref<8x64xf32, #tpu.memory_space<vmem>>, %arg3: memref<8x64xf32, #tpu.memory_space<vmem>>, %arg4: memref<8x64xf32, #tpu.memory_space<vmem>>, %arg5: memref<256x128xf32, #tpu.memory_space<vmem>>, %arg6: memref<1x128xf32, #tpu.memory_space<vmem>>, %arg7: memref<8x128xf32, #tpu.memory_space<vmem>>) attributes {dimension_semantics = [#tpu.dimension_semantics<parallel>], iteration_bounds = array<i64: 1>, scalar_prefetch = 0 : i64, scratch_operands = 0 : i64, tpu.core_type = #tpu.core_type<tc>, window_params = [{transform_indices = @transform_0, window_bounds = array<i64: 8, 64>}, {transform_indices = @transform_1, window_bounds = array<i64: 8, 64>}, {transform_indices = @transform_2, window_bounds = array<i64: 8, 64>}, {transform_indices = @transform_3, window_bounds = array<i64: 8, 64>}, {pipeline_mode = #tpu.pipeline_mode<synchronous>, transform_indices = @transform_4, window_bounds = array<i64: 256, 128>}, {pipeline_mode = #tpu.pipeline_mode<synchronous>, transform_indices = @transform_5, window_bounds = array<i64: 1, 128>}, {transform_indices = @transform_6, window_bounds = array<i64: 8, 128>}]} {
    %c0 = arith.constant 0 : index
    %c0_0 = arith.constant 0 : index
    %0 = vector.load %arg1[%c0, %c0_0] : memref<8x64xf32, #tpu.memory_space<vmem>>, vector<8x64xf32>
    %c0_1 = arith.constant 0 : index
    %c0_2 = arith.constant 0 : index
    %1 = vector.load %arg5[%c0_1, %c0_2] : memref<256x128xf32, #tpu.memory_space<vmem>>, vector<64x128xf32>
    %cst = arith.constant dense<0.000000e+00> : vector<8x128xf32>
    %2 = tpu.matmul %0, %1, %cst {dimension_numbers = #tpu.dot_dimension_numbers<[1], [0], [0], [1], [0, 0, 1, 1], [], []>} : vector<8x64xf32>, vector<64x128xf32>, vector<8x128xf32> -> vector<8x128xf32>
    %c0_3 = arith.constant 0 : index
    %c0_4 = arith.constant 0 : index
    %3 = vector.load %arg2[%c0_3, %c0_4] : memref<8x64xf32, #tpu.memory_space<vmem>>, vector<8x64xf32>
    %c64 = arith.constant 64 : index
    %c0_5 = arith.constant 0 : index
    %4 = vector.load %arg5[%c64, %c0_5] : memref<256x128xf32, #tpu.memory_space<vmem>>, vector<64x128xf32>
    %cst_6 = arith.constant dense<0.000000e+00> : vector<8x128xf32>
    %5 = tpu.matmul %3, %4, %cst_6 {dimension_numbers = #tpu.dot_dimension_numbers<[1], [0], [0], [1], [0, 0, 1, 1], [], []>} : vector<8x64xf32>, vector<64x128xf32>, vector<8x128xf32> -> vector<8x128xf32>
    %6 = arith.addf %2, %5 : vector<8x128xf32>
    %c0_7 = arith.constant 0 : index
    %c0_8 = arith.constant 0 : index
    %7 = vector.load %arg3[%c0_7, %c0_8] : memref<8x64xf32, #tpu.memory_space<vmem>>, vector<8x64xf32>
    %c128 = arith.constant 128 : index
    %c0_9 = arith.constant 0 : index
    %8 = vector.load %arg5[%c128, %c0_9] : memref<256x128xf32, #tpu.memory_space<vmem>>, vector<64x128xf32>
    %cst_10 = arith.constant dense<0.000000e+00> : vector<8x128xf32>
    %9 = tpu.matmul %7, %8, %cst_10 {dimension_numbers = #tpu.dot_dimension_numbers<[1], [0], [0], [1], [0, 0, 1, 1], [], []>} : vector<8x64xf32>, vector<64x128xf32>, vector<8x128xf32> -> vector<8x128xf32>
    %10 = arith.addf %6, %9 : vector<8x128xf32>
    %c0_11 = arith.constant 0 : index
    %c0_12 = arith.constant 0 : index
    %11 = vector.load %arg4[%c0_11, %c0_12] : memref<8x64xf32, #tpu.memory_space<vmem>>, vector<8x64xf32>
    %c192 = arith.constant 192 : index
    %c0_13 = arith.constant 0 : index
    %12 = vector.load %arg5[%c192, %c0_13] : memref<256x128xf32, #tpu.memory_space<vmem>>, vector<64x128xf32>
    %cst_14 = arith.constant dense<0.000000e+00> : vector<8x128xf32>
    %13 = tpu.matmul %11, %12, %cst_14 {dimension_numbers = #tpu.dot_dimension_numbers<[1], [0], [0], [1], [0, 0, 1, 1], [], []>} : vector<8x64xf32>, vector<64x128xf32>, vector<8x128xf32> -> vector<8x128xf32>
    %14 = arith.addf %10, %13 : vector<8x128xf32>
    %c0_15 = arith.constant 0 : index
    %c0_16 = arith.constant 0 : index
    %15 = vector.load %arg6[%c0_15, %c0_16] : memref<1x128xf32, #tpu.memory_space<vmem>>, vector<1x128xf32>
    %16 = vector.broadcast %15 : vector<1x128xf32> to vector<8x128xf32>
    %17 = arith.addf %14, %16 : vector<8x128xf32>
    %c0_17 = arith.constant 0 : index
    %c0_18 = arith.constant 0 : index
    %18 = vector.load %arg7[%c0_17, %c0_18] : memref<8x128xf32, #tpu.memory_space<vmem>>, vector<8x128xf32>
    tpu.vector_store %arg7[%c0_17, %c0_18], %17 {strides = array<i32>} : memref<8x128xf32, #tpu.memory_space<vmem>>, vector<8x128xf32>,
    return
  }
  func.func @transform_0(%arg0: i32) -> (i32, i32) {
    %c0_i32 = arith.constant 0 : i32
    %c0_i32_0 = arith.constant 0 : i32
    return %arg0, %c0_i32 : i32, i32
  }
  func.func @transform_1(%arg0: i32) -> (i32, i32) {
    %c0_i32 = arith.constant 0 : i32
    %c0_i32_0 = arith.constant 0 : i32
    return %arg0, %c0_i32 : i32, i32
  }
  func.func @transform_2(%arg0: i32) -> (i32, i32) {
    %c0_i32 = arith.constant 0 : i32
    %c0_i32_0 = arith.constant 0 : i32
    return %arg0, %c0_i32 : i32, i32
  }
  func.func @transform_3(%arg0: i32) -> (i32, i32) {
    %c0_i32 = arith.constant 0 : i32
    %c0_i32_0 = arith.constant 0 : i32
    return %arg0, %c0_i32 : i32, i32
  }
  func.func @transform_4(%arg0: i32) -> (i32, i32) {
    %c0_i32 = arith.constant 0 : i32
    %c0_i32_0 = arith.constant 0 : i32
    %c0_i32_1 = arith.constant 0 : i32
    return %c0_i32, %c0_i32_0 : i32, i32
  }
  func.func @transform_5(%arg0: i32) -> (i32, i32) {
    %c0_i32 = arith.constant 0 : i32
    %c0_i32_0 = arith.constant 0 : i32
    %c0_i32_1 = arith.constant 0 : i32
    return %c0_i32, %c0_i32_0 : i32, i32
  }
  func.func @transform_6(%arg0: i32) -> (i32, i32) {
    %c0_i32 = arith.constant 0 : i32
    %c0_i32_0 = arith.constant 0 : i32
    return %arg0, %c0_i32 : i32, i32
  }
}

</mosaic_0001>

<bundles_post_ra>
// kernel: tpu_custom_call.1
= control target key start
LH: loop header
LB: loop body
LE: loop exit
PB: predicated region body
PF: predicated region fallthrough
CT: control target
= control target key end

     0   :  { %11 = vsyncpa [#allocation3], 0  ;;  %s869_s0 = inlined_call_operand.hbm [shape: f32[8,64], index: 0, kind: input, shape index: {}]   ;;  %s870_s1 = inlined_call_operand.hbm [shape: f32[8,64], index: 1, kind: input, shape index: {}]   ;;  %s871_s2 = inlined_call_operand.hbm [shape: f32[8,64], index: 2, kind: input, shape index: {}]   ;;  %s872_s3 = inlined_call_operand.vmem [shape: f32[8,64], index: 3, kind: input, shape index: {}]   ;;  %s873_s4 = inlined_call_operand.hbm [shape: f32[256,128], index: 4, kind: input, shape index: {}]   ;;  %s874_s5 = inlined_call_operand.vmem [shape: f32[1,128], index: 5, kind: input, shape index: {}]   ;;  %s875_s6 = inlined_call_operand.hbm [shape: f32[8,128], index: 6, kind: output, shape index: {}]  }
   0x1   :  { %12 = vsyncpa [#allocation6], 0 }
   0x2   :  { %13 = vsyncpa [#allocation9], 0 }
   0x3   :  { %14 = vsyncpa [#allocation4], 0  ;;  %s723_s21 = smov [#allocation5]   ;;  %s724_s23 = smov [#allocation2]  }
   0x4   :  { %s31_s22 = sshll.u32 %s723_s21, 4  ;;  %s21_s24 = sshll.u32 %s724_s23, 4  ;;  %s32_s22 = int_to_ptr.vmem [resolvable:$true] %s31_s22  ;;  %s22_s24 = int_to_ptr.vmem [resolvable:$true] %s21_s24 }
   0x5   :  { %s605_s27 = scalar_lea.hbm %s870_s1, 128 }
   0x6   :  { %p606_p0 = scmp.ne.s32.totalorder %s870_s1, %s605_s27  ;;  %p609_p1 = scmp.lt.u32.totalorder %s605_s27, %s870_s1 }
   0x8   :  { %p611_p2 = pnand %p609_p1, %p606_p0 }
   0xa   :  { %614 = shalt.err (!%p611_p2)
}
   0xb   :  { %s615_s8 = scalar_lea.vmem %s32_s22, 128  ;;  %p620_p4 = scmp.lt.s32.totalorder %s32_s22, %s32_s22 }
   0xc   :  { %p616_p3 = scmp.ne.s32.totalorder %s32_s22, %s615_s8  ;;  %p621_p5 = scmp.lt.s32.totalorder %s615_s8, %s615_s8 }
   0xe   :  { %p622_p6 = por %p621_p5, %p620_p4 }
  0x10   :  { %p623_p7 = pnand %p622_p6, %p616_p3 }
  0x12   :  { %626 = shalt.err (!%p623_p7)
}
  0x13   :  { %34 = dma.hbm_to_vmem [thread:$0]  %s870_s1, 128, %s32_s22, [#allocation6]  }
  0x14   :  { %s627_s13 = scalar_lea.hbm %s869_s0, 128 }
  0x15   :  { %p628_p8 = scmp.ne.s32.totalorder %s869_s0, %s627_s13  ;;  %p631_p9 = scmp.lt.u32.totalorder %s627_s13, %s869_s0 }
  0x17   :  { %p633_p10 = pnand %p631_p9, %p628_p8 }
  0x19   :  { %636 = shalt.err (!%p633_p10)
}
  0x1a   :  { %s637_s18 = scalar_lea.vmem %s22_s24, 128  ;;  %p642_p12 = scmp.lt.s32.totalorder %s22_s24, %s22_s24 }
  0x1b   :  { %p638_p11 = scmp.ne.s32.totalorder %s22_s24, %s637_s18  ;;  %p643_p13 = scmp.lt.s32.totalorder %s637_s18, %s637_s18 }
  0x1d   :  { %p644_p0 = por %p643_p13, %p642_p12 }
  0x1f   :  { %p645_p1 = pnand %p644_p0, %p638_p11 }
  0x21   :  { %648 = shalt.err (!%p645_p1)
}
  0x22   :  { %24 = dma.hbm_to_vmem [thread:$0]  %s869_s0, 128, %s22_s24, [#allocation3]  }
  0x23   :  { %s725_s20 = smov [#allocation7]   ;;  %s726_s22 = smov [#allocation8]  }
  0x24   :  { %s41_s21 = sshll.u32 %s725_s20, 4  ;;  %s52_s23 = sshll.u32 %s726_s22, 4  ;;  %s42_s21 = int_to_ptr.vmem [resolvable:$true] %s41_s21  ;;  %s792_s23 = int_to_ptr.vmem [resolvable:$true] %s52_s23 }
  0x25   :  { %s649_s27 = scalar_lea.hbm %s871_s2, 128 }
  0x26   :  { %p650_p2 = scmp.ne.s32.totalorder %s871_s2, %s649_s27  ;;  %p653_p3 = scmp.lt.u32.totalorder %s649_s27, %s871_s2 }
  0x28   :  { %p655_p4 = pnand %p653_p3, %p650_p2 }
  0x2a   :  { %658 = shalt.err (!%p655_p4)
}
  0x2b   :  { %s659_s0 = scalar_lea.vmem %s42_s21, 128  ;;  %p664_p6 = scmp.lt.s32.totalorder %s42_s21, %s42_s21 }
  0x2c   :  { %p660_p5 = scmp.ne.s32.totalorder %s42_s21, %s659_s0  ;;  %p665_p7 = scmp.lt.s32.totalorder %s659_s0, %s659_s0 }
  0x2e   :  { %p666_p8 = por %p665_p7, %p664_p6 }
  0x30   :  { %p667_p9 = pnand %p666_p8, %p660_p5 }
  0x32   :  { %670 = shalt.err (!%p667_p9)
}
  0x33   :  { %44 = dma.hbm_to_vmem [thread:$0]  %s871_s2, 128, %s42_s21, [#allocation6]  }
  0x34   :  { %s671_s11 = scalar_lea.hbm %s873_s4, 4096 }
  0x35   :  { %p672_p10 = scmp.ne.s32.totalorder %s873_s4, %s671_s11  ;;  %p675_p11 = scmp.lt.u32.totalorder %s671_s11, %s873_s4 }
  0x37   :  { %p677_p12 = pnand %p675_p11, %p672_p10 }
  0x39   :  { %680 = shalt.err (!%p677_p12)
}
  0x3a   :  { %s681_s16 = scalar_lea.vmem %s792_s23, 4096  ;;  %p686_p0 = scmp.lt.s32.totalorder %s792_s23, %s792_s23 }
  0x3b   :  { %p682_p13 = scmp.ne.s32.totalorder %s792_s23, %s681_s16  ;;  %p687_p1 = scmp.lt.s32.totalorder %s681_s16, %s681_s16 }
  0x3d   :  { %p688_p2 = por %p687_p1, %p686_p0 }
  0x3f   :  { %p689_p3 = pnand %p688_p2, %p682_p13 }
  0x41   :  { %692 = shalt.err (!%p689_p3)
}
  0x42   :  { %s727_s2 = smov 128   ;;  %s728_s17 = smov 8  }
  0x43   :  { %58 = dma.hbm_to_vmem [thread:$0]  %s873_s4, 4096, %s792_s23, [#allocation9], %s727_s2, %s727_s2, %s728_s17  }
  0x44   :  { %715 = dma.done.wait [#allocation3], 128  }
  0x45   :  { %716 = vsyncadd [#allocation3], 4294967168 }
  0x46   :  { %717 = dma.done.wait [#allocation6], 256  }
  0x47   :  { %718 = vsyncadd [#allocation6], 4294967040 }
  0x48   :  { %719 = dma.done.wait [#allocation9], 4096  }
  0x49   :  { %720 = vsyncadd [#allocation9], 4294963200  ;;  %v729_v0 = vmov 0.0|0.0   ;;  %vm730_vm0 = vmmov 0   ;;  %v731_v1 = vmov 0.0   ;;  %v83_v2 = vld [vmem:[#allocation8 + $0x40] sm:$0xff] }
  0x4a   :  { %547 = vmatprep.subr.bf16.mxu0 %v729_v0  ;;  %559 = vmatprep.subr.bf16.mxu1 %v729_v0  ;;  %v84_v3 = vld [vmem:[#allocation8 + $0x48] sm:$0xff]  ;;  %v74_v4 = vld [vmem:[#allocation8] sm:$0xff]  ;;  %v85_v7 = vld [vmem:[#allocation8 + $0x50] sm:$0xff]  ;;  %vm91_vm1 = vcmask 523264   ;;  %s732_s22 = smov [#allocation10]  }
  0x4b   :  { %487 = vmatprep.mubr.msk.f32.mxu0 %vm730_vm0, %v731_v1  ;;  %506 = vmatprep.mubr.msk.f32.mxu1 %vm730_vm0, %v731_v1  ;;  %v548_v5 = vpack.c.bf16 %v84_v3, %v83_v2  ;;  %v75_v6 = vld [vmem:[#allocation8 + $0x8] sm:$0xff]  ;;  %v86_v8 = vld [vmem:[#allocation8 + $0x58] sm:$0xff]  ;;  %v76_v10 = vld [vmem:[#allocation8 + $0x10] sm:$0xff] }
  0x4c   :  { %v560_v9 = vpack.c.bf16 %v75_v6, %v74_v4  ;;  %v77_v11 = vld [vmem:[#allocation8 + $0x18] sm:$0xff]  ;;  %v551_v12 = vpack.c.bf16 %v86_v8, %v85_v7  ;;  %v87_v14 = vld [vmem:[#allocation8 + $0x60] sm:$0xff]  ;;  %v88_v15 = vld [vmem:[#allocation8 + $0x68] sm:$0xff] }
  0x4d   :  { %549 = vmatpush3.bf16.msra.mxu0 %v548_v5  ;;  %v563_v13 = vpack.c.bf16 %v77_v11, %v76_v10  ;;  %v78_v16 = vld [vmem:[#allocation8 + $0x20] sm:$0xff]  ;;  %v79_v17 = vld [vmem:[#allocation8 + $0x28] sm:$0xff]  ;;  %v554_v18 = vpack.c.bf16 %v88_v15, %v87_v14  ;;  %v89_v20 = vld [vmem:[#allocation8 + $0x70] sm:$0xff] }
  0x4e   :  { %561 = vmatpush3.bf16.msra.mxu1 %v560_v9  ;;  %550 = vmatprep.subr.bf16.mxu0 %v729_v0  ;;  %v566_v19 = vpack.c.bf16 %v79_v17, %v78_v16  ;;  %v90_v21 = vld [vmem:[#allocation8 + $0x78] sm:$0xff]  ;;  %v80_v22 = vld [vmem:[#allocation8 + $0x30] sm:$0xff]  ;;  %v239_v26 = vld [vmem:[#allocation8 + $0x80] sm:$0xff] }
  0x4f   :  { %562 = vmatprep.subr.bf16.mxu1 %v729_v0  ;;  %v81_v23 = vld [vmem:[#allocation8 + $0x38] sm:$0xff]  ;;  %v557_v24 = vpack.c.bf16 %v90_v21, %v89_v20  ;;  %v240_v27 = vld [vmem:[#allocation8 + $0x88] sm:$0xff]  ;;  %v322_v28 = vld [vmem:[#allocation8 + $0xc0] sm:$0xff] }
  0x50   :  { %v569_v25 = vpack.c.bf16 %v81_v23, %v80_v22  ;;  %v323_v29 = vld [vmem:[#allocation8 + $0xc8] sm:$0xff]  ;;  %v82_v30 = vld [vmem:[#allocation5] sm:$0xff]  ;;  %v572_v31 = vpack.c.bf16 %v240_v27, %v239_v26  ;;  %v242_v35 = vld [vmem:[#allocation8 + $0x98] sm:$0xff] }
  0x51   :  { %552 = vmatpush3.bf16.msra.mxu0 %v551_v12  ;;  %v73_v32 = vld [vmem:[#allocation2] sm:$0xff]  ;;  %v584_v33 = vpack.c.bf16 %v323_v29, %v322_v28  ;;  %v241_v34 = vld [vmem:[#allocation8 + $0x90] sm:$0xff]  ;;  %v325_v37 = vld [vmem:[#allocation8 + $0xd8] sm:$0xff] }
  0x52   :  { %564 = vmatpush3.bf16.msra.mxu1 %v563_v13  ;;  %553 = vmatprep.subr.bf16.mxu0 %v729_v0  ;;  %v324_v36 = vld [vmem:[#allocation8 + $0xd0] sm:$0xff]  ;;  %v575_v38 = vpack.c.bf16 %v242_v35, %v241_v34  ;;  %v243_v40 = vld [vmem:[#allocation8 + $0xa0] sm:$0xff]  ;;  %v244_v41 = vld [vmem:[#allocation8 + $0xa8] sm:$0xff] }
  0x53   :  { %565 = vmatprep.subr.bf16.mxu1 %v729_v0  ;;  %v587_v39 = vpack.c.bf16 %v325_v37, %v324_v36  ;;  %v326_v42 = vld [vmem:[#allocation8 + $0xe0] sm:$0xff]  ;;  %v327_v43 = vld [vmem:[#allocation8 + $0xe8] sm:$0xff]  ;;  %v578_v44 = vpack.c.bf16 %v244_v41, %v243_v40  ;;  %v245_v46 = vld [vmem:[#allocation8 + $0xb0] sm:$0xff] }
  0x54   :  { %v590_v45 = vpack.c.bf16 %v327_v43, %v326_v42  ;;  %v246_v47 = vld [vmem:[#allocation8 + $0xb8] sm:$0xff]  ;;  %v328_v48 = vld [vmem:[#allocation8 + $0xf0] sm:$0xff]  ;;  %v321_v53 = vld [vmem:[%s872_s3] sm:$0xff]  ;;  %s419_s3 = sshll.u32 %s732_s22, 4  ;;  %s420_s3 = int_to_ptr.vmem [resolvable:$true] %s419_s3 }
  0x55   :  { %555 = vmatpush3.bf16.msra.mxu0 %v554_v18  ;;  %v329_v49 = vld [vmem:[#allocation8 + $0xf8] sm:$0xff]  ;;  %v581_v50 = vpack.c.bf16 %v246_v47, %v245_v46  ;;  %v434_v63 = vld [vmem:[%s874_s5] ss:$0 sm:$0xff]  ;;  %s693_s23 = scalar_lea.vmem %s420_s3, 128  ;;  %p698_p5 = scmp.lt.s32.totalorder %s420_s3, %s420_s3 }
  0x56   :  { %567 = vmatpush3.bf16.msra.mxu1 %v566_v19  ;;  %556 = vmatprep.subr.bf16.mxu0 %v729_v0  ;;  %v593_v51 = vpack.c.bf16 %v329_v49, %v328_v48  ;;  %v238_v52 = vld [vmem:[#allocation7] sm:$0xff]  ;;  %p694_p4 = scmp.ne.s32.totalorder %s420_s3, %s693_s23  ;;  %p699_p6 = scmp.lt.s32.totalorder %s693_s23, %s693_s23 }
  0x57   :  { %568 = vmatprep.subr.bf16.mxu1 %v729_v0 }
  0x58   :  { %p700_p7 = por %p699_p6, %p698_p5 }
  0x59   :  { %558 = vmatpush3.bf16.msra.mxu0 %v557_v24 }
  0x5a   :  { %570 = vmatpush3.bf16.msra.mxu1 %v569_v25  ;;  %571 = vmatprep.subr.bf16.mxu0 %v729_v0  ;;  %p701_p8 = pnand %p700_p7, %p694_p4 }
  0x5b   :  { %583 = vmatprep.subr.bf16.mxu1 %v729_v0 }
  0x5c   :  { %488 = vmatmul.mubr.msk.f32.vlgmr.msra.gmra.mrb[0].mxu0 %vm91_vm1, %v82_v30 }
  0x5d   :  { %507 = vmatmul.mubr.msk.f32.vlgmr.msra.gmra.mrb[0].mxu1 %vm91_vm1, %v73_v32  ;;  %573 = vmatpush3.bf16.msra.mxu0 %v572_v31 }
  0x5e   :  { %585 = vmatpush3.bf16.msra.mxu1 %v584_v33  ;;  %574 = vmatprep.subr.bf16.mxu0 %v729_v0 }
  0x5f   :  { %586 = vmatprep.subr.bf16.mxu1 %v729_v0  ;;  %525 = vmatprep.mubr.msk.f32.mxu0 %vm730_vm0, %v731_v1 }
  0x60   :  { %544 = vmatprep.mubr.msk.f32.mxu1 %vm730_vm0, %v731_v1 }
  0x61   :  { %576 = vmatpush3.bf16.msra.mxu0 %v575_v38 }
  0x62   :  { %588 = vmatpush3.bf16.msra.mxu1 %v587_v39  ;;  %577 = vmatprep.subr.bf16.mxu0 %v729_v0 }
  0x63   :  { %589 = vmatprep.subr.bf16.mxu1 %v729_v0 }
  0x65   :  { %579 = vmatpush3.bf16.msra.mxu0 %v578_v44 }
  0x66   :  { %591 = vmatpush3.bf16.msra.mxu1 %v590_v45  ;;  %580 = vmatprep.subr.bf16.mxu0 %v729_v0 }
  0x67   :  { %592 = vmatprep.subr.bf16.mxu1 %v729_v0 }
  0x69   :  { %582 = vmatpush3.bf16.msra.mxu0 %v581_v50 }
  0x6a   :  { %594 = vmatpush3.bf16.msra.mxu1 %v593_v51 }
  0x6c   :  { %526 = vmatmul.mubr.msk.f32.vlgmr.msra.gmra.mrb[2].mxu0 %vm91_vm1, %v238_v52 }
  0x6d   :  { %545 = vmatmul.mubr.msk.f32.vlgmr.msra.gmra.mrb[2].mxu1 %vm91_vm1, %v321_v53 }
 0x12f   :  { %v161_v54 = vpop.f32.mrb[0].mxu0 }
 0x130   :  { %v489_v55 = vpop.f32.mrb[1].mxu0  ;;  %v234_v56 = vpop.f32.mrb[0].mxu1 }
 0x131   :  { %v235_v57 = vadd.f32 %v234_v56, %v161_v54  ;;  %v508_v58 = vpop.f32.mrb[1].mxu1 }
 0x13f   :  { %v316_v59 = vpop.f32.mrb[2].mxu0 }
 0x140   :  { %v320_v60 = vadd.f32 %v316_v59, %v235_v57  ;;  %v527_v61 = vpop.f32.mrb[3].mxu0  ;;  %v399_v62 = vpop.f32.mrb[2].mxu1 }
 0x141   :  { %v546_v0 = vpop.f32.mrb[3].mxu1 }
 0x142   :  { %v403_v1 = vadd.f32 %v399_v62, %v320_v60 }
 0x144   :  { %v411_v2 = vadd.f32 %v434_v63, %v403_v1 }
 0x146   :  { %412 = vst [vmem:[#allocation10] sm:$0xff] %v411_v2 }
 0x147   :  { %704 = shalt.err (!%p701_p8)
}
 0x148   :  { %s705_s27 = scalar_lea.hbm %s875_s6, 128 }
 0x149   :  { %p706_p9 = scmp.ne.s32.totalorder %s875_s6, %s705_s27  ;;  %p709_p10 = scmp.lt.u32.totalorder %s705_s27, %s875_s6 }
 0x14b   :  { %p711_p11 = pnand %p709_p10, %p706_p9 }
 0x14d   :  { %714 = shalt.err (!%p711_p11)
}
 0x14e   :  { %422 = dma.vmem_to_hbm [thread:$0]  %s420_s3, 128, %s875_s6, [#allocation4]  }
 0x14f   :  { %721 = dma.done.wait [#allocation4], 128  }
 0x150   :  { %722 = vsyncadd [#allocation4], 4294967168 }
 0x151   :  { %426 = vsyncpa [#allocation3], 1 }
 0x152   :  { %427 = vsyncpa [#allocation6], 1 }
 0x153   :  { %428 = vsyncpa [#allocation9], 1 }
 0x154   :  { %429 = vsyncpa [#allocation4], 1 }

</bundles_post_ra>
